<compile_context>
chip_gen: v7x
topology: tpu7x:2x2x1
jax: 0.10.0
libtpu: 0.0.40
codegen_flags: <defaults>
</compile_context>

<pallas_src>
import numpy as np
import jax
import jax.numpy as jnp
from jax.experimental import pallas as pl
from jax.experimental.pallas import tpu as pltpu

# ----------------------- deterministic "module init" -----------------------
# Z2 group: mul_table = [[0,1],[1,0]]  -> inv_table = [0,1]
GROUP_ORDER = 2
MUL_TABLE = np.array([[0, 1], [1, 0]], dtype=np.int32)
INV_TABLE = np.array([0, 1], dtype=np.int32)

# Lattice: size=4, dimension=2 -> 16 sites
LATTICE_SIZE = 4
LATTICE_DIM = 2
SITES = LATTICE_SIZE ** LATTICE_DIM

# Energy-term parameters (deterministic, synthetic).
VAL_ONSITE = np.array([1.0, 0.0], dtype=np.float32)    # Group.default_val_table()
VAL_TWOBODY = np.array([1.0, -1.0], dtype=np.float32)
STRENGTH_ONSITE = 0.5
STRENGTH_X = -1.0
STRENGTH_Y = -1.0

LANE_TILE = 8192            # lanes per grid step -> 8*8192 = 65536 samples/step
MIN_GRID_STEPS = 2          # keep >= 2 steps when possible (v7x has 2 TCs/chip)
VMEM_LIMIT_BYTES = 32 * 1024 * 1024   # ~8.5 MiB live at LANE_TILE; ample headroom


# ------------------------------- Pallas kernel ------------------------------
def energy_kernel(x_ref, out_ref):
    """x:   (L, L, 8, bt) int32 -- lattice on leading dims, batch on (sublane, lane).
       out: (8, bt) float32     -- fully dense (unpadded) store, 4 B / sample."""
    x = x_ref[...]

    # Periodic nearest neighbours: static shift-by-one rolls along the
    # *leading* lattice axes (slices + concat over vreg groups -> essentially
    # free; no sublane/lane shuffles, no extra HBM traffic).
    ny = jnp.roll(x, 1, axis=0)   # neighbour along lattice y
    nx = jnp.roll(x, 1, axis=1)   # neighbour along lattice x

    if GROUP_ORDER == 2:
        # Z2 specialisation: inv(g) = g, mul(a, b) = a XOR b,
        #   val_on = [1, 0]  -> sum val_on[x] = S - sum(x)
        #   val_tb = [1, -1] -> sum val_tb[c] = S - 2 * sum(c)
        cy = jnp.bitwise_xor(x, ny)
        cx = jnp.bitwise_xor(x, nx)
        s_x = jnp.sum(x, axis=(0, 1)).astype(jnp.float32)     # (8, bt)
        s_cy = jnp.sum(cy, axis=(0, 1)).astype(jnp.float32)
        s_cx = jnp.sum(cx, axis=(0, 1)).astype(jnp.float32)
        n = jnp.float32(SITES)
        energy = (STRENGTH_ONSITE * (n - s_x)
                  + STRENGTH_X * (n - 2.0 * s_cx)
                  + STRENGTH_Y * (n - 2.0 * s_cy))
    else:
        # Generic small-group path: tables baked in as compile-time constants,
        # unrolled compare/select lookups (never traced for the Z2 instance).
        def lut(idx, table, dtype):
            out = jnp.zeros(idx.shape, dtype)
            for k, v in enumerate(np.asarray(table).reshape(-1)):
                out = jnp.where(idx == k, jnp.asarray(v, dtype), out)
            return out
        inv_x = lut(x, INV_TABLE, jnp.int32)
        cy = lut(inv_x * GROUP_ORDER + ny, MUL_TABLE, jnp.int32)
        cx = lut(inv_x * GROUP_ORDER + nx, MUL_TABLE, jnp.int32)
        energy = (STRENGTH_ONSITE * jnp.sum(lut(x, VAL_ONSITE, jnp.float32),
                                            axis=(0, 1))
                  + STRENGTH_X * jnp.sum(lut(cx, VAL_TWOBODY, jnp.float32),
                                         axis=(0, 1))
                  + STRENGTH_Y * jnp.sum(lut(cy, VAL_TWOBODY, jnp.float32),
                                         axis=(0, 1)))

    out_ref[...] = energy


# ---------------------------------- wrapper ---------------------------------
def _round_up(n, m):
    return ((n + m - 1) // m) * m


def _cdiv(a, b):
    return -(-a // b)


def energy_model_forward(x, *, lane_tile=LANE_TILE, min_grid_steps=MIN_GRID_STEPS):
    """x: (B, SITES) int32 group-element configuration (values in [0, order)).
    Returns (B,) float32 energies."""
    B, S = x.shape
    assert S == SITES, f"expected {SITES} lattice sites, got {S}"
    L = LATTICE_SIZE

    # Batch factorization: sample s -> (sublane r, lane c) with s = r*Bc + c,
    # so both the input block (L, L, 8, bt) and output block (8, bt) are
    # exactly (8, 128)-tiled (zero layout padding in HBM and VMEM).
    bc_needed = _round_up(_cdiv(B, 8), 128)
    bt = min(lane_tile, bc_needed)
    if bc_needed // bt < min_grid_steps and bc_needed > 128:
        # Give every TensorCore at least one grid step (v7x: 2 TCs/chip).
        bt = max(128, _round_up(_cdiv(bc_needed, min_grid_steps), 128))
    bc = _round_up(bc_needed, bt)
    b_pad = 8 * bc

    xp = x.astype(jnp.int32)
    if b_pad != B:
        # Pad with the identity element (0): valid group elements; the
        # corresponding garbage energies are sliced off below.
        xp = jnp.pad(xp, ((0, b_pad - B), (0, 0)))

    # Single wrapper-side layout pass: (b_pad, SITES) -> (8, Bc, L, L)
    # -> (L, L, 8, Bc).  (Producer-side emission of this layout would remove
    # this pass entirely; see TODO at top.)
    x_in = jnp.transpose(xp.reshape(8, bc, L, L), (2, 3, 0, 1))

    out = pl.pallas_call(
        energy_kernel,
        out_shape=jax.ShapeDtypeStruct((8, bc), jnp.float32),
        grid_spec=pltpu.PrefetchScalarGridSpec(
            num_scalar_prefetch=0,
            grid=(bc // bt,),
            in_specs=[pl.BlockSpec((L, L, 8, bt), lambda n: (0, 0, 0, n))],
            out_specs=pl.BlockSpec((8, bt), lambda n: (0, n)),
        ),
        compiler_params=pltpu.CompilerParams(
            dimension_semantics=("parallel",),
            vmem_limit_bytes=VMEM_LIMIT_BYTES),
    )(x_in)

    # out[r, c] is the energy of sample r*Bc + c  ->  row-major flatten.
    return out.reshape(b_pad)[:B]


# ---------------------------- pure-JAX reference ----------------------------
def energy_reference(x):
    B, S = x.shape
    L = LATTICE_SIZE
    inv_t = jnp.asarray(INV_TABLE)
    mul_t = jnp.asarray(MUL_TABLE)
    val_on = jnp.asarray(VAL_ONSITE)
    val_tb = jnp.asarray(VAL_TWOBODY)

    xl = x.reshape(B, L, L)
    ny = jnp.roll(xl, 1, axis=1)   # neighbour along lattice y
    nx = jnp.roll(xl, 1, axis=2)   # neighbour along lattice x

    inv_x = inv_t[xl]
    cy = mul_t[inv_x, ny]
    cx = mul_t[inv_x, nx]
    e = (STRENGTH_ONSITE * val_on[xl]
         + STRENGTH_X * val_tb[cx]
         + STRENGTH_Y * val_tb[cy])
    return e.sum(axis=(1, 2))


if __name__ == "__main__":
    key = jax.random.PRNGKey(0)

    # Small primary test (single grid step).
    B = 8
    x = jax.random.randint(key, (B, SITES), 0, GROUP_ORDER, dtype=jnp.int32)
    out = jax.block_until_ready(energy_model_forward(x))
    ref = energy_reference(x)
    assert out.shape == (B,), out.shape
    assert np.allclose(np.asarray(out), np.asarray(ref), atol=1e-5), (out, ref)

    # Exercise the multi-step pipelined / parallel path with a ragged batch
    # (B not a multiple of 128, padding crossing tile boundaries), cheaply.
    B2 = 2000
    x2 = jax.random.randint(jax.random.PRNGKey(1), (B2, SITES), 0, GROUP_ORDER,
                            dtype=jnp.int32)
    out2 = jax.block_until_ready(energy_model_forward(x2, lane_tile=128))
    ref2 = energy_reference(x2)
    assert out2.shape == (B2,), out2.shape
    assert np.allclose(np.asarray(out2), np.asarray(ref2), atol=1e-5)

    print("KERNEL_OK")
</pallas_src>

<mosaic_0001>
module attributes {stable_mosaic.version = 11 : i64} {
  func.func @energy_kernel(%arg0: i32, %arg1: memref<4x4x8x128xi32, #tpu.memory_space<vmem>>, %arg2: memref<8x128xf32, #tpu.memory_space<vmem>>) attributes {dimension_semantics = [#tpu.dimension_semantics<parallel>], iteration_bounds = array<i64: 1>, scalar_prefetch = 0 : i64, scratch_operands = 0 : i64, tpu.core_type = #tpu.core_type<tc>, window_params = [{transform_indices = @transform_0, window_bounds = array<i64: 4, 4, 8, 128>}, {transform_indices = @transform_1, window_bounds = array<i64: 8, 128>}]} {
    %c0 = arith.constant 0 : index
    %c0_0 = arith.constant 0 : index
    %c0_1 = arith.constant 0 : index
    %c0_2 = arith.constant 0 : index
    %0 = vector.load %arg1[%c0, %c0_0, %c0_1, %c0_2] : memref<4x4x8x128xi32, #tpu.memory_space<vmem>>, vector<4x4x8x128xi32>
    %1 = vector.extract_strided_slice %0 {offsets = [3, 0, 0, 0], sizes = [1, 4, 8, 128], strides = [1, 1, 1, 1]} : vector<4x4x8x128xi32> to vector<1x4x8x128xi32>
    %2 = vector.extract_strided_slice %0 {offsets = [0, 0, 0, 0], sizes = [3, 4, 8, 128], strides = [1, 1, 1, 1]} : vector<4x4x8x128xi32> to vector<3x4x8x128xi32>
    %3 = tpu.concatenate %1, %2 in 0 : vector<1x4x8x128xi32>, vector<3x4x8x128xi32> -> vector<4x4x8x128xi32>
    %4 = vector.extract_strided_slice %0 {offsets = [0, 3, 0, 0], sizes = [4, 1, 8, 128], strides = [1, 1, 1, 1]} : vector<4x4x8x128xi32> to vector<4x1x8x128xi32>
    %5 = vector.extract_strided_slice %0 {offsets = [0, 0, 0, 0], sizes = [4, 3, 8, 128], strides = [1, 1, 1, 1]} : vector<4x4x8x128xi32> to vector<4x3x8x128xi32>
    %6 = tpu.concatenate %4, %5 in 1 : vector<4x1x8x128xi32>, vector<4x3x8x128xi32> -> vector<4x4x8x128xi32>
    %7 = arith.xori %0, %3 : vector<4x4x8x128xi32>
    %8 = arith.xori %0, %6 : vector<4x4x8x128xi32>
    %cst = arith.constant dense<0> : vector<8x128xi32>
    %9 = vector.multi_reduction <add>, %0, %cst [0, 1] : vector<4x4x8x128xi32> to vector<8x128xi32>
    %10 = arith.sitofp %9 : vector<8x128xi32> to vector<8x128xf32>
    %cst_3 = arith.constant dense<0> : vector<8x128xi32>
    %11 = vector.multi_reduction <add>, %7, %cst_3 [0, 1] : vector<4x4x8x128xi32> to vector<8x128xi32>
    %12 = arith.sitofp %11 : vector<8x128xi32> to vector<8x128xf32>
    %cst_4 = arith.constant dense<0> : vector<8x128xi32>
    %13 = vector.multi_reduction <add>, %8, %cst_4 [0, 1] : vector<4x4x8x128xi32> to vector<8x128xi32>
    %14 = arith.sitofp %13 : vector<8x128xi32> to vector<8x128xf32>
    %cst_5 = arith.constant 1.600000e+01 : f32
    %15 = vector.broadcast %cst_5 : f32 to vector<8x128xf32>
    %16 = arith.subf %15, %10 : vector<8x128xf32>
    %cst_6 = arith.constant 5.000000e-01 : f32
    %17 = vector.broadcast %cst_6 : f32 to vector<8x128xf32>
    %18 = arith.mulf %17, %16 : vector<8x128xf32>
    %cst_7 = arith.constant 2.000000e+00 : f32
    %19 = vector.broadcast %cst_7 : f32 to vector<8x128xf32>
    %20 = arith.mulf %19, %14 : vector<8x128xf32>
    %cst_8 = arith.constant 1.600000e+01 : f32
    %21 = vector.broadcast %cst_8 : f32 to vector<8x128xf32>
    %22 = arith.subf %21, %20 : vector<8x128xf32>
    %cst_9 = arith.constant -1.000000e+00 : f32
    %23 = vector.broadcast %cst_9 : f32 to vector<8x128xf32>
    %24 = arith.mulf %23, %22 : vector<8x128xf32>
    %25 = arith.addf %18, %24 : vector<8x128xf32>
    %cst_10 = arith.constant 2.000000e+00 : f32
    %26 = vector.broadcast %cst_10 : f32 to vector<8x128xf32>
    %27 = arith.mulf %26, %12 : vector<8x128xf32>
    %cst_11 = arith.constant 1.600000e+01 : f32
    %28 = vector.broadcast %cst_11 : f32 to vector<8x128xf32>
    %29 = arith.subf %28, %27 : vector<8x128xf32>
    %cst_12 = arith.constant -1.000000e+00 : f32
    %30 = vector.broadcast %cst_12 : f32 to vector<8x128xf32>
    %31 = arith.mulf %30, %29 : vector<8x128xf32>
    %32 = arith.addf %25, %31 : vector<8x128xf32>
    %c0_13 = arith.constant 0 : index
    %c0_14 = arith.constant 0 : index
    %33 = vector.load %arg2[%c0_13, %c0_14] : memref<8x128xf32, #tpu.memory_space<vmem>>, vector<8x128xf32>
    tpu.vector_store %arg2[%c0_13, %c0_14], %32 {strides = array<i32>} : memref<8x128xf32, #tpu.memory_space<vmem>>, vector<8x128xf32>,
    return
  }
  func.func @transform_0(%arg0: i32) -> (i32, i32, i32, i32) {
    %c0_i32 = arith.constant 0 : i32
    %c0_i32_0 = arith.constant 0 : i32
    %c0_i32_1 = arith.constant 0 : i32
    %c0_i32_2 = arith.constant 0 : i32
    return %c0_i32, %c0_i32_0, %c0_i32_1, %arg0 : i32, i32, i32, i32
  }
  func.func @transform_1(%arg0: i32) -> (i32, i32) {
    %c0_i32 = arith.constant 0 : i32
    %c0_i32_0 = arith.constant 0 : i32
    return %c0_i32, %arg0 : i32, i32
  }
}

</mosaic_0001>

<bundles_post_ra>
// kernel: tpu_custom_call.1
= control target key start
LH: loop header
LB: loop body
LE: loop exit
PB: predicated region body
PF: predicated region fallthrough
CT: control target
= control target key end

     0   :  { %6 = vsyncpa [#allocation3], 0  ;;  %s353_s0 = inlined_call_operand.hbm [shape: s32[4,4,8,128], index: 0, kind: input, shape index: {}]   ;;  %s354_s1 = inlined_call_operand.hbm [shape: f32[8,128], index: 1, kind: output, shape index: {}]  }
   0x1   :  { %7 = vsyncpa [#allocation4], 0  ;;  %s197_s6 = smov [#allocation2]   ;;  %s149_s10 = scalar_lea.hbm %s353_s0, 2048 }
   0x2   :  { %s13_s7 = sshll.u32 %s197_s6, 4  ;;  %p150_p0 = scmp.ne.s32.totalorder %s353_s0, %s149_s10  ;;  %s14_s7 = int_to_ptr.vmem [resolvable:$true] %s13_s7 }
   0x3   :  { %p153_p1 = scmp.lt.u32.totalorder %s149_s10, %s353_s0 }
   0x5   :  { %p155_p2 = pnand %p153_p1, %p150_p0 }
   0x7   :  { %158 = shalt.err (!%p155_p2)
}
   0x8   :  { %s159_s15 = scalar_lea.vmem %s14_s7, 2048  ;;  %p164_p4 = scmp.lt.s32.totalorder %s14_s7, %s14_s7 }
   0x9   :  { %p160_p3 = scmp.ne.s32.totalorder %s14_s7, %s159_s15  ;;  %p165_p5 = scmp.lt.s32.totalorder %s159_s15, %s159_s15 }
   0xb   :  { %p166_p6 = por %p165_p5, %p164_p4 }
   0xd   :  { %p167_p7 = pnand %p166_p6, %p160_p3 }
   0xf   :  { %170 = shalt.err (!%p167_p7)
}
  0x10   :  { %s198_s16 = smov 128   ;;  %s199_s17 = smov 8  }
  0x11   :  { %19 = dma.hbm_to_vmem [thread:$0]  %s353_s0, 2048, %s14_s7, [#allocation3], %s198_s16, %s198_s16, %s199_s17  }
  0x12   :  { %193 = dma.done.wait [#allocation3], 2048  }
  0x13   :  { %194 = vsyncadd [#allocation3], 4294965248  ;;  %v223_v0 = vld [vmem:[#allocation2] sm:$0xff]  ;;  %v225_v1 = vld [vmem:[#allocation2 + $0x8] sm:$0xff]  ;;  %s200_s0 = smov [#allocation5]  }
  0x14   :  { %v227_v2 = vld [vmem:[#allocation2 + $0x10] sm:$0xff]  ;;  %v229_v3 = vld [vmem:[#allocation2 + $0x18] sm:$0xff]  ;;  %v231_v4 = vld [vmem:[#allocation2 + $0x20] sm:$0xff]  ;;  %v56_v6 = vxor.u32 %v225_v1, %v223_v0  ;;  %s136_s20 = sshll.u32 %s200_s0, 4  ;;  %s137_s20 = int_to_ptr.vmem [resolvable:$true] %s136_s20 }
  0x15   :  { %v233_v5 = vld [vmem:[#allocation2 + $0x28] sm:$0xff]  ;;  %v237_v7 = vld [vmem:[#allocation2 + $0x30] sm:$0xff]  ;;  %v239_v8 = vld [vmem:[#allocation2 + $0x38] sm:$0xff]  ;;  %v43_v10 = vxor.u32 %v231_v4, %v223_v0  ;;  %v55_v12 = vxor.u32 %v229_v3, %v223_v0  ;;  %v57_v13 = vxor.u32 %v227_v2, %v225_v1  ;;  %v58_v20 = vxor.u32 %v229_v3, %v227_v2  ;;  %s171_s21 = scalar_lea.vmem %s137_s20, 128  ;;  %p176_p9 = scmp.lt.s32.totalorder %s137_s20, %s137_s20 }
  0x16   :  { %v241_v9 = vld [vmem:[#allocation2 + $0x40] sm:$0xff]  ;;  %v44_v11 = vxor.u32 %v233_v5, %v225_v1  ;;  %v251_v14 = vld [vmem:[#allocation2 + $0x48] sm:$0xff]  ;;  %v253_v15 = vld [vmem:[#allocation2 + $0x50] sm:$0xff]  ;;  %v45_v17 = vxor.u32 %v237_v7, %v227_v2  ;;  %v46_v18 = vxor.u32 %v239_v8, %v229_v3  ;;  %v59_v27 = vxor.u32 %v239_v8, %v231_v4  ;;  %p172_p8 = scmp.ne.s32.totalorder %s137_s20, %s171_s21  ;;  %p177_p10 = scmp.lt.s32.totalorder %s171_s21, %s171_s21 }
  0x17   :  { %v255_v16 = vld [vmem:[#allocation2 + $0x58] sm:$0xff]  ;;  %v47_v19 = vxor.u32 %v241_v9, %v231_v4  ;;  %v265_v21 = vld [vmem:[#allocation2 + $0x60] sm:$0xff]  ;;  %v267_v22 = vld [vmem:[#allocation2 + $0x68] sm:$0xff]  ;;  %v48_v24 = vxor.u32 %v251_v14, %v233_v5  ;;  %v49_v25 = vxor.u32 %v253_v15, %v237_v7  ;;  %v60_v32 = vxor.u32 %v233_v5, %v231_v4 }
  0x18   :  { %v269_v23 = vld [vmem:[#allocation2 + $0x70] sm:$0xff]  ;;  %v50_v26 = vxor.u32 %v255_v16, %v239_v8  ;;  %v279_v28 = vld [vmem:[#allocation2 + $0x78] sm:$0xff]  ;;  %v39_v29 = vxor.u32 %v265_v21, %v223_v0  ;;  %v40_v30 = vxor.u32 %v267_v22, %v225_v1  ;;  %v51_v34 = vxor.u32 %v265_v21, %v241_v9  ;;  %p178_p11 = por %p177_p10, %p176_p9 }
  0x19   :  { %v41_v31 = vxor.u32 %v269_v23, %v227_v2  ;;  %v42_v33 = vxor.u32 %v279_v28, %v229_v3  ;;  %v52_v35 = vxor.u32 %v267_v22, %v251_v14  ;;  %v53_v36 = vxor.u32 %v269_v23, %v253_v15 }
  0x1a   :  { %v54_v37 = vxor.u32 %v279_v28, %v255_v16  ;;  %v61_v38 = vxor.u32 %v237_v7, %v233_v5  ;;  %v62_v39 = vxor.u32 %v239_v8, %v237_v7  ;;  %v63_v40 = vxor.u32 %v255_v16, %v241_v9  ;;  %p179_p12 = pnand %p178_p11, %p172_p8 }
  0x1b   :  { %v64_v41 = vxor.u32 %v251_v14, %v241_v9  ;;  %v65_v42 = vxor.u32 %v253_v15, %v251_v14  ;;  %v66_v43 = vxor.u32 %v255_v16, %v253_v15  ;;  %v67_v44 = vxor.u32 %v279_v28, %v265_v21 }
  0x1c   :  { %v68_v45 = vxor.u32 %v267_v22, %v265_v21  ;;  %v69_v46 = vxor.u32 %v269_v23, %v267_v22  ;;  %v71_v47 = vadd.s32 %v231_v4, %v223_v0  ;;  %v72_v48 = vadd.s32 %v233_v5, %v225_v1 }
  0x1d   :  { %v73_v49 = vadd.s32 %v237_v7, %v227_v2  ;;  %v74_v50 = vadd.s32 %v239_v8, %v229_v3  ;;  %v87_v51 = vadd.s32 %v43_v10, %v39_v29  ;;  %v88_v52 = vadd.s32 %v44_v11, %v40_v30 }
  0x1e   :  { %v75_v53 = vadd.s32 %v71_v47, %v241_v9  ;;  %v76_v54 = vadd.s32 %v72_v48, %v251_v14  ;;  %v89_v55 = vadd.s32 %v45_v17, %v41_v31  ;;  %v90_v56 = vadd.s32 %v46_v18, %v42_v33 }
  0x1f   :  { %v77_v57 = vadd.s32 %v73_v49, %v253_v15  ;;  %v78_v58 = vadd.s32 %v74_v50, %v255_v16  ;;  %v91_v59 = vadd.s32 %v87_v51, %v47_v19  ;;  %v92_v60 = vadd.s32 %v88_v52, %v48_v24 }
  0x20   :  { %v79_v61 = vadd.s32 %v75_v53, %v265_v21  ;;  %v80_v62 = vadd.s32 %v76_v54, %v267_v22  ;;  %v93_v63 = vadd.s32 %v89_v55, %v49_v25  ;;  %v94_v3 = vadd.s32 %v90_v56, %v50_v26 }
  0x21   :  { %v81_v4 = vadd.s32 %v77_v57, %v269_v23  ;;  %v82_v5 = vadd.s32 %v78_v58, %v279_v28  ;;  %v95_v7 = vadd.s32 %v91_v59, %v51_v34  ;;  %v96_v8 = vadd.s32 %v92_v60, %v52_v35 }
  0x22   :  { %v83_v9 = vadd.s32 %v80_v62, %v79_v61  ;;  %v97_v10 = vadd.s32 %v93_v63, %v53_v36  ;;  %v98_v11 = vadd.s32 %v94_v3, %v54_v37  ;;  %v103_v14 = vadd.s32 %v59_v27, %v55_v12 }
  0x23   :  { %v84_v15 = vadd.s32 %v82_v5, %v81_v4  ;;  %v99_v16 = vadd.s32 %v96_v8, %v95_v7  ;;  %v104_v17 = vadd.s32 %v60_v32, %v56_v6  ;;  %v105_v18 = vadd.s32 %v61_v38, %v57_v13 }
  0x24   :  { %v70_v19 = vxor.u32 %v279_v28, %v269_v23  ;;  %v100_v21 = vadd.s32 %v98_v11, %v97_v10  ;;  %v106_v22 = vadd.s32 %v62_v39, %v58_v20  ;;  %v107_v24 = vadd.s32 %v103_v14, %v63_v40 }
  0x25   :  { %v108_v25 = vadd.s32 %v104_v17, %v64_v41  ;;  %v109_v26 = vadd.s32 %v105_v18, %v65_v42  ;;  %v85_v29 = vadd.s32 %v84_v15, %v83_v9 }
  0x26   :  { %v101_v12 = vadd.s32 %v100_v21, %v99_v16  ;;  %v110_v27 = vadd.s32 %v106_v22, %v66_v43  ;;  %v111_v30 = vadd.s32 %v107_v24, %v67_v44 }
  0x27   :  { %v112_v31 = vadd.s32 %v108_v25, %v68_v45  ;;  %v113_v33 = vadd.s32 %v109_v26, %v69_v46  ;;  %v86_v34 = vcvt.s32.f32 %v85_v29 }
  0x28   :  { %v102_v0 = vcvt.s32.f32 %v101_v12  ;;  %v114_v6 = vadd.s32 %v110_v27, %v70_v19 }
  0x29   :  { %v115_v32 = vadd.s32 %v112_v31, %v111_v30  ;;  %v119_v23 = vsub.f32 16.0, %v86_v34 }
  0x2a   :  { %v116_v1 = vadd.s32 %v114_v6, %v113_v33  ;;  %v125_v13 = vmul.f32 2.0, %v102_v0 }
  0x2b   :  { %v120_v36 = vmul.f32 0.5, %v119_v23 }
  0x2c   :  { %v117_v2 = vadd.s32 %v116_v1, %v115_v32  ;;  %v126_v20 = vsub.f32 16.0, %v125_v13 }
  0x2e   :  { %v118_v35 = vcvt.s32.f32 %v117_v2  ;;  %v127_v39 = vmul.f32 -1.0, %v126_v20 }
  0x30   :  { %v121_v28 = vmul.f32 2.0, %v118_v35 }
  0x32   :  { %v122_v37 = vsub.f32 16.0, %v121_v28 }
  0x34   :  { %v123_v38 = vmul.f32 -1.0, %v122_v37 }
  0x36   :  { %v124_v40 = vadd.f32 %v123_v38, %v120_v36 }
  0x38   :  { %v128_v41 = vadd.f32 %v127_v39, %v124_v40 }
  0x3a   :  { %129 = vst [vmem:[#allocation5] sm:$0xff] %v128_v41 }
  0x3b   :  { %182 = shalt.err (!%p179_p12)
}
  0x3c   :  { %s183_s24 = scalar_lea.hbm %s354_s1, 128 }
  0x3d   :  { %p184_p13 = scmp.ne.s32.totalorder %s354_s1, %s183_s24  ;;  %p187_p0 = scmp.lt.u32.totalorder %s183_s24, %s354_s1 }
  0x3f   :  { %p189_p1 = pnand %p187_p0, %p184_p13 }
  0x41   :  { %192 = shalt.err (!%p189_p1)
}
  0x42   :  { %139 = dma.vmem_to_hbm [thread:$0]  %s137_s20, 128, %s354_s1, [#allocation4]  }
  0x43   :  { %195 = dma.done.wait [#allocation4], 128  }
  0x44   :  { %196 = vsyncadd [#allocation4], 4294967168 }
  0x45   :  { %143 = vsyncpa [#allocation3], 1 }
  0x46   :  { %144 = vsyncpa [#allocation4], 1 }

</bundles_post_ra>
